<compile_context>
chip_gen: v7x
topology: tpu7x:2x2x1
jax: 0.10.0
libtpu: 0.0.40
codegen_flags: <defaults>
</compile_context>

<pallas_src>
import math

import jax
import jax.numpy as jnp
from jax import lax
from jax.experimental import pallas as pl
from jax.experimental.pallas import tpu as pltpu

EPS = 1e-32                      # matches NestedCrossEntropyLoss(eps=1e-32)
LOG_EPS = math.log(EPS)          # clamp(p, eps).log() == max(log p, log eps)
NEG = -1e30                      # padding logit for extra class columns
LANE = 128
SUBLANE = 8
VMEM_LIMIT_BYTES = 40 << 20      # above 16/32 MiB scoped defaults, < v7x 64 MiB
MAX_BLOCK_ROWS = 2048
TILE_VMEM_BUDGET = 24 << 20      # budget for double-buffered input tiles


def _round_up(x, m):
    return ((x + m - 1) // m) * m


def _choose_block_rows(n_rows, c_pad, n_wide_inputs):
    """Largest row tile (multiple of 8) whose double-buffered tiles fit budget."""
    per_row_bytes = 2 * n_wide_inputs * c_pad * 4      # 2x buffered f32 tiles
    br = TILE_VMEM_BUDGET // per_row_bytes
    br = int(min(br, MAX_BLOCK_ROWS, _round_up(n_rows, SUBLANE)))
    return max(SUBLANE, (br // SUBLANE) * SUBLANE)


# ----------------------------- Pallas kernels ------------------------------ #
def _ce_label_kernel(x_ref, lbl_ref, out_ref):
    """Per-tile partial of -sum(max(logp[label], log eps)) over valid rows."""
    x = x_ref[...].astype(jnp.float32)                  # (bR, Cp)
    lbl = lbl_ref[...]                                  # (bR, 1) int32, -1 = pad
    m = jnp.max(x, axis=-1, keepdims=True)
    lse = m + jnp.log(jnp.sum(jnp.exp(x - m), axis=-1, keepdims=True))
    col = lax.broadcasted_iota(jnp.int32, x.shape, 1)
    picked = jnp.sum(jnp.where(col == lbl, x, 0.0), axis=-1, keepdims=True)
    logp = jnp.maximum(picked - lse, LOG_EPS)           # == clamp(p,eps).log()
    valid = (lbl >= 0).astype(jnp.float32)              # mask padded rows
    partial = -jnp.sum(logp * valid)
    out_ref[...] = jnp.full(out_ref.shape, partial, dtype=jnp.float32)


def _ce_dist_kernel(x_ref, y_ref, out_ref):
    """Per-tile partial of -sum(y * max(log_softmax(x), log eps))."""
    x = x_ref[...].astype(jnp.float32)
    y = y_ref[...].astype(jnp.float32)
    m = jnp.max(x, axis=-1, keepdims=True)
    lse = m + jnp.log(jnp.sum(jnp.exp(x - m), axis=-1, keepdims=True))
    logp = jnp.maximum(x - lse, LOG_EPS)
    partial = -jnp.sum(y * logp)
    out_ref[...] = jnp.full(out_ref.shape, partial, dtype=jnp.float32)


# ----------------------------- Pallas wrappers ------------------------------ #
def _ce_partial_sums(kernel, x_p, aux_p, block_rows):
    n_pad, c_pad = x_p.shape
    num_tiles = n_pad // block_rows
    aux_cols = aux_p.shape[1]
    out = pl.pallas_call(
        kernel,
        out_shape=jax.ShapeDtypeStruct((num_tiles, SUBLANE, LANE), jnp.float32),
        grid_spec=pltpu.PrefetchScalarGridSpec(
            num_scalar_prefetch=0,
            grid=(num_tiles,),
            in_specs=[
                pl.BlockSpec((block_rows, c_pad), lambda i: (i, 0)),
                pl.BlockSpec((block_rows, aux_cols), lambda i: (i, 0)),
            ],
            out_specs=pl.BlockSpec((1, SUBLANE, LANE), lambda i: (i, 0, 0)),
        ),
        compiler_params=pltpu.CompilerParams(
            dimension_semantics=("parallel",),        # megacore-friendly on v7x
            vmem_limit_bytes=VMEM_LIMIT_BYTES,
        ),
    )(x_p, aux_p)
    # Per-tile partials reduced in plain JAX (better conditioned than a single
    # resident scalar accumulator, and allows the parallel grid above).
    return jnp.sum(out[:, 0, 0])


def cross_entropy_sum_labels(x, labels, block_rows=None):
    """-sum(log(clamp(softmax(x), eps))[row, label]) / len(x), labels int32."""
    n, c = x.shape
    c_pad = _round_up(max(c, LANE), LANE)
    if block_rows is None:
        block_rows = _choose_block_rows(n, c_pad, n_wide_inputs=1)
    n_pad = _round_up(n, block_rows)

    x_p = x
    if c_pad != c:
        x_p = jnp.pad(x_p, ((0, 0), (0, c_pad - c)), constant_values=NEG)
    if n_pad != n:
        x_p = jnp.pad(x_p, ((0, n_pad - n), (0, 0)), constant_values=0.0)

    lbl = labels.astype(jnp.int32).reshape(n, 1)
    if n_pad != n:
        lbl = jnp.pad(lbl, ((0, n_pad - n), (0, 0)), constant_values=-1)

    return _ce_partial_sums(_ce_label_kernel, x_p, lbl, block_rows) / n


def cross_entropy_sum_dist(x, y_dist, block_rows=None):
    """-sum(y * log(clamp(softmax(x), eps))) / len(x) for dense targets y."""
    n, c = x.shape
    c_pad = _round_up(max(c, LANE), LANE)
    if block_rows is None:
        block_rows = _choose_block_rows(n, c_pad, n_wide_inputs=2)
    n_pad = _round_up(n, block_rows)

    x_p = x
    y_p = y_dist.astype(jnp.float32)
    if c_pad != c:
        x_p = jnp.pad(x_p, ((0, 0), (0, c_pad - c)), constant_values=NEG)
        y_p = jnp.pad(y_p, ((0, 0), (0, c_pad - c)), constant_values=0.0)
    if n_pad != n:
        x_p = jnp.pad(x_p, ((0, n_pad - n), (0, 0)), constant_values=0.0)
        y_p = jnp.pad(y_p, ((0, n_pad - n), (0, 0)), constant_values=0.0)

    return _ce_partial_sums(_ce_dist_kernel, x_p, y_p, block_rows) / n


# --------------------------- plain-JAX glue -------------------------------- #
def sumup_by_index(logits, idxs):
    """NestedCrossEntropyLoss.sumup_by_index (last-dim merge, static indices)."""
    c = logits.shape[-1]
    merged = []
    drop = set()
    for idx in idxs:
        cols = jnp.asarray(idx, dtype=jnp.int32)
        merged.append(jnp.sum(logits[..., cols], axis=-1, keepdims=True))
        drop.update(idx)
    keep = [i for i in range(c) if i not in drop]
    if keep:
        rest = logits[..., jnp.asarray(keep, dtype=jnp.int32)]
        parts = [rest] + merged
    else:
        parts = merged
    return jnp.concatenate(parts, axis=-1)


def _groups_disjoint(idxs):
    flat = [c for g in idxs for c in g]
    return len(flat) == len(set(flat))


def _build_class_map(c, idxs):
    """original class id -> column index in sumup_by_index(...) output."""
    drop = set()
    for g in idxs:
        drop.update(g)
    keep = [i for i in range(c) if i not in drop]
    cmap = [0] * c
    for pos, col in enumerate(keep):
        cmap[col] = pos
    for j, g in enumerate(idxs):
        for col in g:
            cmap[col] = len(keep) + j
    return jnp.asarray(cmap, dtype=jnp.int32)


def nested_cross_entropy_loss(x, y, rules=None, by_index=True):
    """Forward pass of NestedCrossEntropyLoss (sum_logits is unused upstream)."""
    n, c = x.shape
    if by_index:
        labels = y.astype(jnp.int32)
    else:
        ydist = y.astype(jnp.float32)

    if not rules:
        if by_index:
            return cross_entropy_sum_labels(x, labels)
        return cross_entropy_sum_dist(x, ydist)

    # NOTE: matches PyTorch semantics — base CE is NOT part of the return value
    # when rules exist, so it is not computed here.
    # TODO(synk): fuse the per-rule column merges into the kernel via
    # scalar-prefetched group-id tables so the rules path costs a single
    # additional HBM pass over x instead of one pass per rule.
    losses = []
    total_weight = 0.0
    for rule in rules:
        idxs = rule["index"]
        new_x = sumup_by_index(x, idxs)
        if by_index and _groups_disjoint(idxs):
            cmap = _build_class_map(c, idxs)
            loss_r = cross_entropy_sum_labels(new_x, cmap[labels])
        else:
            yd = jax.nn.one_hot(labels, c, dtype=jnp.float32) if by_index else ydist
            loss_r = cross_entropy_sum_dist(new_x, sumup_by_index(yd, idxs))
        losses.append(loss_r * rule["weight"])
        total_weight += rule["weight"]
    return jnp.sum(jnp.stack(losses)) / total_weight


# ------------------------------ reference ---------------------------------- #
def _ref_ce(x, y_dense):
    p = jax.nn.softmax(x.astype(jnp.float32), axis=-1)
    return -jnp.sum(y_dense * jnp.log(jnp.maximum(p, EPS))) / x.shape[0]


def _ref_loss(x, y, rules=None, by_index=True):
    if by_index:
        yd = jax.nn.one_hot(y, x.shape[-1], dtype=jnp.float32)
    else:
        yd = y.astype(jnp.float32)
    if not rules:
        return _ref_ce(x, yd)
    ll, tw = [], 0.0
    for rule in rules:
        ll.append(_ref_ce(sumup_by_index(x, rule["index"]),
                          sumup_by_index(yd, rule["index"])) * rule["weight"])
        tw += rule["weight"]
    return jnp.sum(jnp.stack(ll)) / tw


# ------------------------------- main --------------------------------------- #
if __name__ == "__main__":
    key = jax.random.PRNGKey(0)
    kx, ky, kx2, ky2, kd = jax.random.split(key, 5)

    rules = [
        {"index": [[0, 1, 2], [3, 4]], "weight": 1.0},
        {"index": [[5, 6, 7, 8, 9]], "weight": 0.5},
    ]

    # 1) default config: rules=None, by_index=True
    N, C = 16, 10
    x = jax.random.normal(kx, (N, C), dtype=jnp.float32)
    y = jax.random.randint(ky, (N,), 0, C, dtype=jnp.int32)
    out = jax.block_until_ready(nested_cross_entropy_loss(x, y))
    ref = _ref_loss(x, y)
    assert jnp.allclose(out, ref, rtol=1e-5, atol=1e-5), (out, ref)

    # 2) nested rules
    out = jax.block_until_ready(nested_cross_entropy_loss(x, y, rules=rules))
    ref = _ref_loss(x, y, rules=rules)
    assert jnp.allclose(out, ref, rtol=1e-5, atol=1e-5), (out, ref)

    # 3) non-divisible N exercises the row padding + in-kernel masking path
    N2 = 23
    x2 = jax.random.normal(kx2, (N2, C), dtype=jnp.float32)
    y2 = jax.random.randint(ky2, (N2,), 0, C, dtype=jnp.int32)
    out = jax.block_until_ready(nested_cross_entropy_loss(x2, y2, rules=rules))
    ref = _ref_loss(x2, y2, rules=rules)
    assert jnp.allclose(out, ref, rtol=1e-5, atol=1e-5), (out, ref)

    # 4) by_index=False (soft targets) exercises the distribution kernel
    ydist = jax.nn.softmax(jax.random.normal(kd, (N, C), dtype=jnp.float32), axis=-1)
    out = jax.block_until_ready(nested_cross_entropy_loss(x, ydist, by_index=False))
    ref = _ref_loss(x, ydist, by_index=False)
    assert jnp.allclose(out, ref, rtol=1e-5, atol=1e-5), (out, ref)

    print("KERNEL_OK")
</pallas_src>

<mosaic_0001>
module attributes {stable_mosaic.version = 11 : i64} {
  func.func @_ce_label_kernel(%arg0: i32, %arg1: memref<16x128xf32, #tpu.memory_space<vmem>>, %arg2: memref<16x1xi32, #tpu.memory_space<vmem>>, %arg3: memref<1x8x128xf32, #tpu.memory_space<vmem>>) attributes {dimension_semantics = [#tpu.dimension_semantics<parallel>], iteration_bounds = array<i64: 1>, scalar_prefetch = 0 : i64, scratch_operands = 0 : i64, tpu.core_type = #tpu.core_type<tc>, window_params = [{transform_indices = @transform_0, window_bounds = array<i64: 16, 128>}, {transform_indices = @transform_1, window_bounds = array<i64: 16, 1>}, {transform_indices = @transform_2, window_bounds = array<i64: 1, 8, 128>}]} {
    %c0 = arith.constant 0 : index
    %c0_0 = arith.constant 0 : index
    %0 = vector.load %arg1[%c0, %c0_0] : memref<16x128xf32, #tpu.memory_space<vmem>>, vector<16x128xf32>
    %c0_1 = arith.constant 0 : index
    %c0_2 = arith.constant 0 : index
    %1 = vector.load %arg2[%c0_1, %c0_2] : memref<16x1xi32, #tpu.memory_space<vmem>>, vector<16x1xi32>
    %cst = arith.constant dense<0xFF800000> : vector<16xf32>
    %2 = vector.multi_reduction <maximumf>, %0, %cst [1] : vector<16x128xf32> to vector<16xf32>
    %3 = vector.shape_cast %2 : vector<16xf32> to vector<16x1xf32>
    %4 = vector.broadcast %3 : vector<16x1xf32> to vector<16x128xf32>
    %5 = arith.subf %0, %4 : vector<16x128xf32>
    %6 = math.exp %5 : vector<16x128xf32>
    %cst_3 = arith.constant dense<0.000000e+00> : vector<16xf32>
    %7 = vector.multi_reduction <add>, %6, %cst_3 [1] : vector<16x128xf32> to vector<16xf32>
    %8 = vector.shape_cast %7 : vector<16xf32> to vector<16x1xf32>
    %9 = math.log %8 : vector<16x1xf32>
    %10 = arith.addf %3, %9 : vector<16x1xf32>
    %11 = tpu.iota {dimensions = array<i32: 1>} : vector<16x128xi32>
    %12 = vector.broadcast %1 : vector<16x1xi32> to vector<16x128xi32>
    %13 = arith.cmpi eq, %11, %12 : vector<16x128xi32>
    %cst_4 = arith.constant 0.000000e+00 : f32
    %14 = vector.broadcast %cst_4 : f32 to vector<16x128xf32>
    %15 = arith.select %13, %0, %14 : vector<16x128xi1>, vector<16x128xf32>
    %cst_5 = arith.constant dense<0.000000e+00> : vector<16xf32>
    %16 = vector.multi_reduction <add>, %15, %cst_5 [1] : vector<16x128xf32> to vector<16xf32>
    %17 = vector.shape_cast %16 : vector<16xf32> to vector<16x1xf32>
    %18 = arith.subf %17, %10 : vector<16x1xf32>
    %cst_6 = arith.constant -73.6827239 : f32
    %19 = vector.broadcast %cst_6 : f32 to vector<16x1xf32>
    %20 = arith.maximumf %18, %19 : vector<16x1xf32>
    %c0_i32 = arith.constant 0 : i32
    %21 = vector.broadcast %c0_i32 : i32 to vector<16x1xi32>
    %22 = arith.cmpi sge, %1, %21 : vector<16x1xi32>
    %23 = arith.extui %22 : vector<16x1xi1> to vector<16x1xi32>
    %24 = arith.sitofp %23 : vector<16x1xi32> to vector<16x1xf32>
    %25 = arith.mulf %20, %24 : vector<16x1xf32>
    %26 = vector.shape_cast %25 : vector<16x1xf32> to vector<1x16x1xf32>
    %cst_7 = arith.constant dense<0.000000e+00> : vector<1xf32>
    %27 = vector.multi_reduction <add>, %26, %cst_7 [1, 2] : vector<1x16x1xf32> to vector<1xf32>
    %28 = vector.shape_cast %27 : vector<1xf32> to vector<1x1x1xf32>
    %29 = vector.extract %28[0, 0, 0] : f32 from vector<1x1x1xf32>
    %cst_8 = arith.constant 0.000000e+00 : f32
    %30 = arith.subf %cst_8, %29 : f32
    %31 = vector.broadcast %30 : f32 to vector<1x8x128xf32>
    %c0_9 = arith.constant 0 : index
    %c0_10 = arith.constant 0 : index
    %c0_11 = arith.constant 0 : index
    %32 = vector.load %arg3[%c0_9, %c0_10, %c0_11] : memref<1x8x128xf32, #tpu.memory_space<vmem>>, vector<1x8x128xf32>
    tpu.vector_store %arg3[%c0_9, %c0_10, %c0_11], %31 {strides = array<i32>} : memref<1x8x128xf32, #tpu.memory_space<vmem>>, vector<1x8x128xf32>,
    return
  }
  func.func @transform_0(%arg0: i32) -> (i32, i32) {
    %c0_i32 = arith.constant 0 : i32
    %c0_i32_0 = arith.constant 0 : i32
    return %arg0, %c0_i32 : i32, i32
  }
  func.func @transform_1(%arg0: i32) -> (i32, i32) {
    %c0_i32 = arith.constant 0 : i32
    %c0_i32_0 = arith.constant 0 : i32
    return %arg0, %c0_i32 : i32, i32
  }
  func.func @transform_2(%arg0: i32) -> (i32, i32, i32) {
    %c0_i32 = arith.constant 0 : i32
    %c0_i32_0 = arith.constant 0 : i32
    %c0_i32_1 = arith.constant 0 : i32
    return %arg0, %c0_i32, %c0_i32_0 : i32, i32, i32
  }
}

</mosaic_0001>

<bundles_post_ra>
// kernel: tpu_custom_call.1
= control target key start
LH: loop header
LB: loop body
LE: loop exit
PB: predicated region body
PF: predicated region fallthrough
CT: control target
= control target key end

     0   :  { %v135_v2 = vmov 0   ;;  %s177_s0 = inlined_call_operand.vmem [shape: f32[16,128], index: 0, kind: input, shape index: {}]   ;;  %s178_s1 = inlined_call_operand.vmem [shape: s32[16,1], index: 1, kind: input, shape index: {}]   ;;  %s179_s2 = inlined_call_operand.hbm [shape: f32[1,8,128], index: 2, kind: output, shape index: {}]  }
   0x1   :  { %v12_v0 = vld [vmem:[%s177_s0] sm:$0xff]  ;;  %101 = vset.pattern.permute.xlu1 %v135_v2 }
   0x2   :  { %v14_v1 = vld [vmem:[%s178_s1] sm:$0xff]  ;;  %16 = vmax.xlane.f32.xlu0 %v12_v0 }
   0x3   :  { %7 = vsyncpa [#allocation3], 0  ;;  %v13_v3 = vld [vmem:[%s177_s0 + $0x8] sm:$0xff]  ;;  %39 = vperm.xlu1 %101, %v14_v1   ;;  %102 = vset.pattern.permute.xlu0 %v135_v2  ;;  %v36_v10 = vlaneseq  ;;  %vm56_vm2 = vcmp.ge.s32.totalorder %v14_v1, 0  ;;  %v136_v30 = vmov 0.0   ;;  %vm64_vm4 = vcmask 7168  }
   0x4   :  { %v15_v4 = vld [vmem:[%s178_s1 + $0x8] sm:$0xff]  ;;  %v94_v31 = vsel %vm56_vm2, 1.0, %v136_v30  ;;  %s137_s0 = smov [#allocation2]  }
   0x5   :  { %v37_v13 = vand.u32 127, %v36_v10  ;;  %vm57_vm3 = vcmp.ge.s32.totalorder %v15_v4, 0  ;;  %s86_s1 = sshll.u32 %s137_s0, 4  ;;  %s87_s1 = int_to_ptr.vmem [resolvable:$true] %s86_s1 }
   0x6   :  { %18 = vmax.xlane.f32.xlu0 %v13_v3  ;;  %v95_v34 = vsel %vm57_vm3, 1.0, %v136_v30  ;;  %s111_s19 = scalar_lea.vmem %s87_s1, 128  ;;  %p116_p1 = scmp.lt.s32.totalorder %s87_s1, %s87_s1 }
   0x7   :  { %42 = vperm.xlu1 %101, %v15_v4   ;;  %p112_p0 = scmp.ne.s32.totalorder %s87_s1, %s111_s19  ;;  %p117_p2 = scmp.lt.s32.totalorder %s111_s19, %s111_s19 }
   0x9   :  { %p118_p3 = por %p117_p2, %p116_p1 }
   0xb   :  { %p119_p4 = pnand %p118_p3, %p112_p0 }
  0x82   :  { %v40_v12 = vpop.permute.xlu1 %39 }
  0x83   :  { %vm44_vm0 = vcmp.eq.s32.totalorder %v37_v13, %v40_v12 }
  0x84   :  { %v46_v16 = vsel %vm44_vm0, %v12_v0, 0.0 }
  0x86   :  { %v43_v15 = vpop.permute.xlu1 %42 }
  0x87   :  { %vm45_vm1 = vcmp.eq.s32.totalorder %v37_v13, %v43_v15 }
  0x88   :  { %v47_v18 = vsel %vm45_vm1, %v13_v3, 0.0 }
  0x8f   :  { %v17_v5 = vpop.xlane.xlu0 %16 }
  0x90   :  { %v20_v6 = vsub.f32 %v12_v0, %v17_v5 }
  0x92   :  { %v22_v7 = vmul.f32 1.442695, %v20_v6 }
  0x93   :  { %v19_v8 = vpop.xlane.xlu0 %18 }
  0x94   :  { %103 = vpow2.f32 %v22_v7  ;;  %v21_v9 = vsub.f32 %v13_v3, %v19_v8 }
  0x96   :  { %v24_v11 = vmul.f32 1.442695, %v21_v9 }
  0x98   :  { %105 = vpow2.f32 %v24_v11 }
  0x9e   :  { %v104_v14 = vpop.eup %103 }
  0x9f   :  { %26 = vadd.xlane.f32.xlu0 %v104_v14 }
  0xa2   :  { %v106_v17 = vpop.eup %105 }
  0xa3   :  { %28 = vadd.xlane.f32.xlu1 %v106_v17  ;;  %48 = vadd.xlane.f32.xlu0 %v46_v16 }
  0xa7   :  { %50 = vadd.xlane.f32.xlu0 %v47_v18 }
 0x12c   :  { %v27_v19 = vpop.xlane.xlu0 %26 }
 0x12d   :  { %107 = vlog2.f32 %v27_v19 }
 0x130   :  { %v29_v20 = vpop.xlane.xlu1 %28  ;;  %v49_v23 = vpop.xlane.xlu0 %48 }
 0x131   :  { %109 = vlog2.f32 %v29_v20 }
 0x134   :  { %v51_v32 = vpop.xlane.xlu0 %50 }
 0x137   :  { %v108_v21 = vpop.eup %107 }
 0x138   :  { %v31_v22 = vmul.f32 0.6931472, %v108_v21 }
 0x13a   :  { %v34_v24 = vadd.f32 %v31_v22, %v17_v5 }
 0x13b   :  { %v110_v25 = vpop.eup %109 }
 0x13c   :  { %v33_v26 = vmul.f32 0.6931472, %v110_v25  ;;  %v52_v27 = vsub.f32 %v49_v23, %v34_v24 }
 0x13e   :  { %v54_v28 = vmax.f32 %v52_v27, -73.682724  ;;  %v35_v29 = vadd.f32 %v33_v26, %v19_v8 }
 0x140   :  { %v53_v33 = vsub.f32 %v51_v32, %v35_v29  ;;  %v62_v35 = vmul.f32 %v94_v31, %v54_v28 }
 0x142   :  { %v55_v36 = vmax.f32 %v53_v33, -73.682724  ;;  %v65_v38 = vsel %vm64_vm4, %v62_v35, 0.0 }
 0x144   :  { %v63_v37 = vmul.f32 %v95_v34, %v55_v36 }
 0x146   :  { %v66_v39 = vsel %vm64_vm4, %v63_v37, 0.0 }
 0x147   :  { %v67_v40 = vadd.f32 %v66_v39, %v65_v38 }
 0x149   :  { %68 = vadd.xlane.f32.xlu0 %v67_v40 }
 0x1d6   :  { %v69_v41 = vpop.xlane.xlu0 %68 }
 0x1d7   :  { %v70_v42 = vrot.slane %v69_v41, 4 }
 0x1d9   :  { %v71_v43 = vadd.f32 %v70_v42, %v69_v41 }
 0x1db   :  { %v72_v44 = vrot.slane %v71_v43, 2 }
 0x1dd   :  { %v73_v45 = vadd.f32 %v72_v44, %v71_v43 }
 0x1df   :  { %v74_v46 = vrot.slane %v73_v45, 1 }
 0x1e1   :  { %v75_v47 = vadd.f32 %v74_v46, %v73_v45 }
 0x1e3   :  { %96 = vpush %v75_v47 }
 0x214   :  { %s97_s17 = spop %96 }
 0x215   :  { %s77_s18 = ssub.f32 0.0, %s97_s17 }
 0x217   :  { %v78_v48 = vstv %s77_s18 }
 0x218   :  { %79 = vst [vmem:[#allocation2] sm:$0xff] %v78_v48 }
 0x219   :  { %122 = shalt.err (!%p119_p4)
}
 0x21a   :  { %s123_s22 = scalar_lea.hbm %s179_s2, 128 }
 0x21b   :  { %p124_p5 = scmp.ne.s32.totalorder %s179_s2, %s123_s22  ;;  %p127_p6 = scmp.lt.u32.totalorder %s123_s22, %s179_s2 }
 0x21d   :  { %p129_p7 = pnand %p127_p6, %p124_p5 }
 0x21f   :  { %132 = shalt.err (!%p129_p7)
}
 0x220   :  { %89 = dma.vmem_to_hbm [thread:$0]  %s87_s1, 128, %s179_s2, [#allocation3]  }
 0x221   :  { %133 = dma.done.wait [#allocation3], 128  }
 0x222   :  { %134 = vsyncadd [#allocation3], 4294967168 }
 0x223   :  { %93 = vsyncpa [#allocation3], 1 }

</bundles_post_ra>
